<compile_context>
chip_gen: v7x
topology: tpu7x:2x2x1
jax: 0.10.0
libtpu: 0.0.40
codegen_flags: <defaults>
</compile_context>

<pallas_src>
import functools

import jax
import jax.numpy as jnp
from jax.experimental import pallas as pl
from jax.experimental.pallas import tpu as pltpu

# SELU constants (match torch.nn.functional.selu)
_SELU_ALPHA = 1.6732632423543772
_SELU_SCALE = 1.0507009873554805
_LANE = 128


def _round_up(n, m):
    return (n + m - 1) // m * m


def _expm1(x):
    """expm1 without relying on a lax.expm1 Mosaic lowering.

    |x| < 2^-5: 4-term Taylor (rel err ~1e-8, no cancellation);
    otherwise exp(x) - 1 (rel err <= ~4e-6 in that range). Uses only
    exp/mul/add/where, which all lower on TPU.
    """
    small = jnp.abs(x) < 0.03125
    taylor = x * (1.0 + x * (0.5 + x * (1.0 / 6.0 + x * (1.0 / 24.0))))
    return jnp.where(small, taylor, jnp.exp(x) - 1.0)


def _selu(x):
    # Elementwise math stays in f32 (v5e VPU/EUP have no bf16 mode).
    # Clamp the expm1 argument to <=0: the positive branch never uses it and
    # this keeps garbage rows of a ragged last tile from overflowing to inf.
    neg = _SELU_ALPHA * _expm1(jnp.minimum(x, 0.0))
    return _SELU_SCALE * jnp.where(x > 0, x, neg)


def _mlp_kernel(x_ref, p_ref, w1x_ref, w1p_ref, b1_ref,
                w2_ref, b2_ref, w3_ref, b3_ref, o_ref):
    """One batch tile of torch_wrapper.forward.

    fc1(cat([x, p, t*ones], 1)) is evaluated as split matmuls, with the
    t-column already folded into b1 by the wrapper, so no concatenated input
    is ever built in HBM or VMEM. fc1 runs in f32 (K=4/3 -> negligible MXU
    cost, exact parity with the torch f32 math); fc2/fcLast use bf16 MXU
    inputs with f32 accumulation; bias adds and SELU stay f32.
    """
    # fc1 + SELU (f32)
    h1 = jnp.dot(x_ref[...], w1x_ref[...], preferred_element_type=jnp.float32)
    h1 = h1 + jnp.dot(p_ref[...], w1p_ref[...],
                      preferred_element_type=jnp.float32)
    h1 = _selu(h1 + b1_ref[...])

    # fc2 + SELU
    h2 = jnp.dot(h1.astype(jnp.bfloat16), w2_ref[...],
                 preferred_element_type=jnp.float32)
    h2 = _selu(h2 + b2_ref[...])

    # fcLast (no activation)
    out = jnp.dot(h2.astype(jnp.bfloat16), w3_ref[...],
                  preferred_element_type=jnp.float32)
    o_ref[...] = (out + b3_ref[...]).astype(o_ref.dtype)


def init_params(key, x_dim, p_dim, hidden_dim):
    """nn.Linear-style init; weights stored as (in, out) so kernel does x @ W + b.

    fc1:    (x_dim + p_dim + 1) -> hidden_dim
    fc2:    hidden_dim          -> hidden_dim * 2
    fcLast: hidden_dim * 2      -> x_dim
    """
    in_dim = x_dim + p_dim + 1
    k1, k2, k3, k4, k5, k6 = jax.random.split(key, 6)

    def lin(kw, kb, fan_in, fan_out):
        bound = 1.0 / jnp.sqrt(fan_in)
        w = jax.random.uniform(kw, (fan_in, fan_out), jnp.float32, -bound, bound)
        b = jax.random.uniform(kb, (1, fan_out), jnp.float32, -bound, bound)
        return w, b

    w1, b1 = lin(k1, k2, in_dim, hidden_dim)
    w2, b2 = lin(k3, k4, hidden_dim, hidden_dim * 2)
    w3, b3 = lin(k5, k6, hidden_dim * 2, x_dim)
    return (w1, b1, w2, b2, w3, b3)


def prepare_params(params, x_dim, p_dim):
    """Split W1 into (x, p, t) pieces, zero-pad hidden dims to the 128-lane
    width, and pre-cast the fc2/fc3 MXU operands to bf16 (fc1 pieces, the
    t-row and all biases stay f32)."""
    w1, b1, w2, b2, w3, b3 = params
    h1, h2 = w1.shape[1], w2.shape[1]
    h1p, h2p = _round_up(h1, _LANE), _round_up(h2, _LANE)

    pad_c = lambda a, n: jnp.pad(a, ((0, 0), (0, n - a.shape[1])))
    pad_r = lambda a, n: jnp.pad(a, ((0, n - a.shape[0]), (0, 0)))

    return dict(
        w1x=pad_c(w1[:x_dim], h1p).astype(jnp.float32),
        w1p=pad_c(w1[x_dim:x_dim + p_dim], h1p).astype(jnp.float32),
        w1t=pad_c(w1[x_dim + p_dim:x_dim + p_dim + 1], h1p).astype(jnp.float32),
        b1=pad_c(b1, h1p).astype(jnp.float32),
        w2=pad_c(pad_r(w2, h1p), h2p).astype(jnp.bfloat16),
        b2=pad_c(b2, h2p).astype(jnp.float32),
        w3=pad_r(w3, h2p).astype(jnp.bfloat16),
        b3=b3.astype(jnp.float32),
    )


def _choose_tile(batch, block_b):
    """Batch tile: as large as block_b (multiple of 8), but with >=2 grid
    steps whenever batch >= 16 so v7x megacore can shard the 'parallel' axis.
    Small batches use a single full-extent block (always legal)."""
    if batch < 16:
        return batch
    if batch <= block_b:
        return min(block_b, _round_up(pl.cdiv(batch, 2), 8))
    return block_b


@functools.partial(jax.jit, static_argnames=("block_b",))
def torch_wrapper_forward(t, x, p, prepped, block_b=2048):
    """Pallas implementation of torch_wrapper.forward(t, x, p)."""
    B, x_dim = x.shape
    p_dim = p.shape[1]
    h1p = prepped["w1x"].shape[1]
    h2p = prepped["w2"].shape[1]
    out_dim = prepped["w3"].shape[1]

    # Fold the t-column of fc1 into the bias (a 1 x h1p op in the wrapper):
    #   fc1(cat([x, p, t·1])) == x @ W1x + p @ W1p + (b1 + t * W1t)
    t_val = jnp.asarray(t, jnp.float32)
    b1_eff = prepped["b1"] + t_val * prepped["w1t"]

    tb = _choose_tile(B, block_b)
    grid = (pl.cdiv(B, tb),)

    batch_spec = lambda feat: pl.BlockSpec((tb, feat), lambda i: (i, 0))
    resident = lambda a: pl.BlockSpec(a.shape, lambda i: (0, 0))

    weight_bytes = sum(int(a.size) * a.dtype.itemsize for a in prepped.values())
    cost = pl.CostEstimate(
        flops=2 * B * ((x_dim + p_dim) * h1p + h1p * h2p + h2p * out_dim),
        transcendentals=B * (h1p + h2p),
        bytes_accessed=B * 4 * (x_dim + p_dim + out_dim) + weight_bytes,
    )

    return pl.pallas_call(
        _mlp_kernel,
        out_shape=jax.ShapeDtypeStruct((B, out_dim), jnp.float32),
        grid=grid,
        in_specs=[
            batch_spec(x_dim),            # x  (streamed / double-buffered)
            batch_spec(p_dim),            # p  (streamed / double-buffered)
            resident(prepped["w1x"]),     # weights: constant index_map, VMEM-resident
            resident(prepped["w1p"]),
            resident(b1_eff),
            resident(prepped["w2"]),
            resident(prepped["b2"]),
            resident(prepped["w3"]),
            resident(prepped["b3"]),
        ],
        # Output stays at x_dim lanes: padding to 128 would inflate HBM
        # writeback ~32x, which outweighs the lane-dense-store win here.
        out_specs=batch_spec(out_dim),
        compiler_params=pltpu.CompilerParams(
            dimension_semantics=("parallel",),
            vmem_limit_bytes=32 << 20),
        cost_estimate=cost,
    )(x, p,
      prepped["w1x"], prepped["w1p"], b1_eff,
      prepped["w2"], prepped["b2"], prepped["w3"], prepped["b3"])


def reference_forward(t, x, p, params):
    """Pure-JAX f32 reference matching the torch module exactly."""
    w1, b1, w2, b2, w3, b3 = params

    def selu(v):
        return _SELU_SCALE * jnp.where(v > 0, v, _SELU_ALPHA * jnp.expm1(v))

    xin = jnp.concatenate(
        [x, p, jnp.full((x.shape[0], 1), t, x.dtype)], axis=1)
    h = selu(xin @ w1 + b1)
    h = selu(h @ w2 + b2)
    return h @ w3 + b3


if __name__ == "__main__":
    # Small shapes consistent with the module: x_dim=4, p_dim=3, hidden_dim=32.
    x_dim, p_dim, hidden_dim = 4, 3, 32

    key = jax.random.PRNGKey(0)
    kparam, kx, kp, kx2, kp2 = jax.random.split(key, 5)
    params = init_params(kparam, x_dim, p_dim, hidden_dim)
    prepped = prepare_params(params, x_dim, p_dim)
    t = jnp.float32(0.5)

    def check(batch, kxx, kpp):
        x = jax.random.normal(kxx, (batch, x_dim), jnp.float32)
        p = jax.random.normal(kpp, (batch, p_dim), jnp.float32)
        out = jax.block_until_ready(torch_wrapper_forward(t, x, p, prepped))
        ref = reference_forward(t, x, p, params)
        assert out.shape == (batch, x_dim)
        max_err = float(jnp.max(jnp.abs(out - ref)))
        # bf16 MXU inputs on fc2/fc3 with f32 accumulation -> small drift.
        assert jnp.allclose(out, ref, atol=5e-2, rtol=5e-2), \
            f"mismatch at B={batch}: {max_err}"

    check(8, kx, kp)      # single full-extent tile
    check(64, kx2, kp2)   # 2-step grid (exercises tiling / megacore split)

    print("KERNEL_OK")
</pallas_src>

<mosaic_0001>
module attributes {stable_mosaic.version = 11 : i64} {
  func.func @_mlp_kernel(%arg0: i32, %arg1: memref<8x4xf32, #tpu.memory_space<vmem>>, %arg2: memref<8x3xf32, #tpu.memory_space<vmem>>, %arg3: memref<4x128xf32, #tpu.memory_space<vmem>>, %arg4: memref<3x128xf32, #tpu.memory_space<vmem>>, %arg5: memref<1x128xf32, #tpu.memory_space<vmem>>, %arg6: memref<128x128xbf16, #tpu.memory_space<vmem>>, %arg7: memref<1x128xf32, #tpu.memory_space<vmem>>, %arg8: memref<128x4xbf16, #tpu.memory_space<vmem>>, %arg9: memref<1x4xf32, #tpu.memory_space<vmem>>, %arg10: memref<8x4xf32, #tpu.memory_space<vmem>>) attributes {dimension_semantics = [#tpu.dimension_semantics<parallel>], iteration_bounds = array<i64: 1>, scalar_prefetch = 0 : i64, scratch_operands = 0 : i64, tpu.core_type = #tpu.core_type<tc>, window_params = [{transform_indices = @transform_0, window_bounds = array<i64: 8, 4>}, {transform_indices = @transform_1, window_bounds = array<i64: 8, 3>}, {pipeline_mode = #tpu.pipeline_mode<synchronous>, transform_indices = @transform_2, window_bounds = array<i64: 4, 128>}, {pipeline_mode = #tpu.pipeline_mode<synchronous>, transform_indices = @transform_3, window_bounds = array<i64: 3, 128>}, {pipeline_mode = #tpu.pipeline_mode<synchronous>, transform_indices = @transform_4, window_bounds = array<i64: 1, 128>}, {pipeline_mode = #tpu.pipeline_mode<synchronous>, transform_indices = @transform_5, window_bounds = array<i64: 128, 128>}, {pipeline_mode = #tpu.pipeline_mode<synchronous>, transform_indices = @transform_6, window_bounds = array<i64: 1, 128>}, {pipeline_mode = #tpu.pipeline_mode<synchronous>, transform_indices = @transform_7, window_bounds = array<i64: 128, 4>}, {pipeline_mode = #tpu.pipeline_mode<synchronous>, transform_indices = @transform_8, window_bounds = array<i64: 1, 4>}, {transform_indices = @transform_9, window_bounds = array<i64: 8, 4>}]} {
    %c0 = arith.constant 0 : index
    %c0_0 = arith.constant 0 : index
    %0 = vector.load %arg1[%c0, %c0_0] : memref<8x4xf32, #tpu.memory_space<vmem>>, vector<8x4xf32>
    %c0_1 = arith.constant 0 : index
    %c0_2 = arith.constant 0 : index
    %1 = vector.load %arg3[%c0_1, %c0_2] : memref<4x128xf32, #tpu.memory_space<vmem>>, vector<4x128xf32>
    %cst = arith.constant dense<0.000000e+00> : vector<8x128xf32>
    %2 = tpu.matmul %0, %1, %cst {dimension_numbers = #tpu.dot_dimension_numbers<[1], [0], [0], [1], [0, 0, 1, 1], [], []>} : vector<8x4xf32>, vector<4x128xf32>, vector<8x128xf32> -> vector<8x128xf32>
    %c0_3 = arith.constant 0 : index
    %c0_4 = arith.constant 0 : index
    %3 = vector.load %arg2[%c0_3, %c0_4] : memref<8x3xf32, #tpu.memory_space<vmem>>, vector<8x3xf32>
    %c0_5 = arith.constant 0 : index
    %c0_6 = arith.constant 0 : index
    %4 = vector.load %arg4[%c0_5, %c0_6] : memref<3x128xf32, #tpu.memory_space<vmem>>, vector<3x128xf32>
    %cst_7 = arith.constant dense<0.000000e+00> : vector<8x128xf32>
    %5 = tpu.matmul %3, %4, %cst_7 {dimension_numbers = #tpu.dot_dimension_numbers<[1], [0], [0], [1], [0, 0, 1, 1], [], []>} : vector<8x3xf32>, vector<3x128xf32>, vector<8x128xf32> -> vector<8x128xf32>
    %6 = arith.addf %2, %5 : vector<8x128xf32>
    %c0_8 = arith.constant 0 : index
    %c0_9 = arith.constant 0 : index
    %7 = vector.load %arg5[%c0_8, %c0_9] : memref<1x128xf32, #tpu.memory_space<vmem>>, vector<1x128xf32>
    %8 = vector.broadcast %7 : vector<1x128xf32> to vector<8x128xf32>
    %9 = arith.addf %6, %8 : vector<8x128xf32>
    %cst_10 = arith.constant 0.000000e+00 : f32
    %10 = vector.broadcast %cst_10 : f32 to vector<8x128xf32>
    %11 = arith.minimumf %9, %10 : vector<8x128xf32>
    %12 = math.absf %11 : vector<8x128xf32>
    %cst_11 = arith.constant 3.125000e-02 : f32
    %13 = vector.broadcast %cst_11 : f32 to vector<8x128xf32>
    %14 = arith.cmpf olt, %12, %13 : vector<8x128xf32>
    %cst_12 = arith.constant 0.0416666679 : f32
    %15 = vector.broadcast %cst_12 : f32 to vector<8x128xf32>
    %16 = arith.mulf %11, %15 : vector<8x128xf32>
    %cst_13 = arith.constant 0.166666672 : f32
    %17 = vector.broadcast %cst_13 : f32 to vector<8x128xf32>
    %18 = arith.addf %17, %16 : vector<8x128xf32>
    %19 = arith.mulf %11, %18 : vector<8x128xf32>
    %cst_14 = arith.constant 5.000000e-01 : f32
    %20 = vector.broadcast %cst_14 : f32 to vector<8x128xf32>
    %21 = arith.addf %20, %19 : vector<8x128xf32>
    %22 = arith.mulf %11, %21 : vector<8x128xf32>
    %cst_15 = arith.constant 1.000000e+00 : f32
    %23 = vector.broadcast %cst_15 : f32 to vector<8x128xf32>
    %24 = arith.addf %23, %22 : vector<8x128xf32>
    %25 = arith.mulf %11, %24 : vector<8x128xf32>
    %26 = math.exp %11 : vector<8x128xf32>
    %cst_16 = arith.constant 1.000000e+00 : f32
    %27 = vector.broadcast %cst_16 : f32 to vector<8x128xf32>
    %28 = arith.subf %26, %27 : vector<8x128xf32>
    %29 = arith.select %14, %25, %28 : vector<8x128xi1>, vector<8x128xf32>
    %cst_17 = arith.constant 1.67326319 : f32
    %30 = vector.broadcast %cst_17 : f32 to vector<8x128xf32>
    %31 = arith.mulf %30, %29 : vector<8x128xf32>
    %cst_18 = arith.constant 0.000000e+00 : f32
    %32 = vector.broadcast %cst_18 : f32 to vector<8x128xf32>
    %33 = arith.cmpf ogt, %9, %32 : vector<8x128xf32>
    %34 = arith.select %33, %9, %31 : vector<8x128xi1>, vector<8x128xf32>
    %cst_19 = arith.constant 1.05070102 : f32
    %35 = vector.broadcast %cst_19 : f32 to vector<8x128xf32>
    %36 = arith.mulf %35, %34 : vector<8x128xf32>
    %37 = arith.truncf %36 : vector<8x128xf32> to vector<8x128xbf16>
    %c0_20 = arith.constant 0 : index
    %c0_21 = arith.constant 0 : index
    %38 = vector.load %arg6[%c0_20, %c0_21] : memref<128x128xbf16, #tpu.memory_space<vmem>>, vector<128x128xbf16>
    %cst_22 = arith.constant dense<0.000000e+00> : vector<8x128xf32>
    %39 = tpu.matmul %37, %38, %cst_22 {dimension_numbers = #tpu.dot_dimension_numbers<[1], [0], [0], [1], [0, 0, 1, 1], [], []>} : vector<8x128xbf16>, vector<128x128xbf16>, vector<8x128xf32> -> vector<8x128xf32>
    %c0_23 = arith.constant 0 : index
    %c0_24 = arith.constant 0 : index
    %40 = vector.load %arg7[%c0_23, %c0_24] : memref<1x128xf32, #tpu.memory_space<vmem>>, vector<1x128xf32>
    %41 = vector.broadcast %40 : vector<1x128xf32> to vector<8x128xf32>
    %42 = arith.addf %39, %41 : vector<8x128xf32>
    %cst_25 = arith.constant 0.000000e+00 : f32
    %43 = vector.broadcast %cst_25 : f32 to vector<8x128xf32>
    %44 = arith.minimumf %42, %43 : vector<8x128xf32>
    %45 = math.absf %44 : vector<8x128xf32>
    %cst_26 = arith.constant 3.125000e-02 : f32
    %46 = vector.broadcast %cst_26 : f32 to vector<8x128xf32>
    %47 = arith.cmpf olt, %45, %46 : vector<8x128xf32>
    %cst_27 = arith.constant 0.0416666679 : f32
    %48 = vector.broadcast %cst_27 : f32 to vector<8x128xf32>
    %49 = arith.mulf %44, %48 : vector<8x128xf32>
    %cst_28 = arith.constant 0.166666672 : f32
    %50 = vector.broadcast %cst_28 : f32 to vector<8x128xf32>
    %51 = arith.addf %50, %49 : vector<8x128xf32>
    %52 = arith.mulf %44, %51 : vector<8x128xf32>
    %cst_29 = arith.constant 5.000000e-01 : f32
    %53 = vector.broadcast %cst_29 : f32 to vector<8x128xf32>
    %54 = arith.addf %53, %52 : vector<8x128xf32>
    %55 = arith.mulf %44, %54 : vector<8x128xf32>
    %cst_30 = arith.constant 1.000000e+00 : f32
    %56 = vector.broadcast %cst_30 : f32 to vector<8x128xf32>
    %57 = arith.addf %56, %55 : vector<8x128xf32>
    %58 = arith.mulf %44, %57 : vector<8x128xf32>
    %59 = math.exp %44 : vector<8x128xf32>
    %cst_31 = arith.constant 1.000000e+00 : f32
    %60 = vector.broadcast %cst_31 : f32 to vector<8x128xf32>
    %61 = arith.subf %59, %60 : vector<8x128xf32>
    %62 = arith.select %47, %58, %61 : vector<8x128xi1>, vector<8x128xf32>
    %cst_32 = arith.constant 1.67326319 : f32
    %63 = vector.broadcast %cst_32 : f32 to vector<8x128xf32>
    %64 = arith.mulf %63, %62 : vector<8x128xf32>
    %cst_33 = arith.constant 0.000000e+00 : f32
    %65 = vector.broadcast %cst_33 : f32 to vector<8x128xf32>
    %66 = arith.cmpf ogt, %42, %65 : vector<8x128xf32>
    %67 = arith.select %66, %42, %64 : vector<8x128xi1>, vector<8x128xf32>
    %cst_34 = arith.constant 1.05070102 : f32
    %68 = vector.broadcast %cst_34 : f32 to vector<8x128xf32>
    %69 = arith.mulf %68, %67 : vector<8x128xf32>
    %70 = arith.truncf %69 : vector<8x128xf32> to vector<8x128xbf16>
    %c0_35 = arith.constant 0 : index
    %c0_36 = arith.constant 0 : index
    %71 = vector.load %arg8[%c0_35, %c0_36] : memref<128x4xbf16, #tpu.memory_space<vmem>>, vector<128x4xbf16>
    %cst_37 = arith.constant dense<0.000000e+00> : vector<8x4xf32>
    %72 = tpu.matmul %70, %71, %cst_37 {dimension_numbers = #tpu.dot_dimension_numbers<[1], [0], [0], [1], [0, 0, 1, 1], [], []>} : vector<8x128xbf16>, vector<128x4xbf16>, vector<8x4xf32> -> vector<8x4xf32>
    %c0_38 = arith.constant 0 : index
    %c0_39 = arith.constant 0 : index
    %73 = vector.load %arg9[%c0_38, %c0_39] : memref<1x4xf32, #tpu.memory_space<vmem>>, vector<1x4xf32>
    %74 = vector.broadcast %73 : vector<1x4xf32> to vector<8x4xf32>
    %75 = arith.addf %72, %74 : vector<8x4xf32>
    %c0_40 = arith.constant 0 : index
    %c0_41 = arith.constant 0 : index
    %76 = vector.load %arg10[%c0_40, %c0_41] : memref<8x4xf32, #tpu.memory_space<vmem>>, vector<8x4xf32>
    tpu.vector_store %arg10[%c0_40, %c0_41], %75 {strides = array<i32>} : memref<8x4xf32, #tpu.memory_space<vmem>>, vector<8x4xf32>,
    return
  }
  func.func @transform_0(%arg0: i32) -> (i32, i32) {
    %c0_i32 = arith.constant 0 : i32
    %c0_i32_0 = arith.constant 0 : i32
    return %arg0, %c0_i32 : i32, i32
  }
  func.func @transform_1(%arg0: i32) -> (i32, i32) {
    %c0_i32 = arith.constant 0 : i32
    %c0_i32_0 = arith.constant 0 : i32
    return %arg0, %c0_i32 : i32, i32
  }
  func.func @transform_2(%arg0: i32) -> (i32, i32) {
    %c0_i32 = arith.constant 0 : i32
    %c0_i32_0 = arith.constant 0 : i32
    %c0_i32_1 = arith.constant 0 : i32
    return %c0_i32, %c0_i32_0 : i32, i32
  }
  func.func @transform_3(%arg0: i32) -> (i32, i32) {
    %c0_i32 = arith.constant 0 : i32
    %c0_i32_0 = arith.constant 0 : i32
    %c0_i32_1 = arith.constant 0 : i32
    return %c0_i32, %c0_i32_0 : i32, i32
  }
  func.func @transform_4(%arg0: i32) -> (i32, i32) {
    %c0_i32 = arith.constant 0 : i32
    %c0_i32_0 = arith.constant 0 : i32
    %c0_i32_1 = arith.constant 0 : i32
    return %c0_i32, %c0_i32_0 : i32, i32
  }
  func.func @transform_5(%arg0: i32) -> (i32, i32) {
    %c0_i32 = arith.constant 0 : i32
    %c0_i32_0 = arith.constant 0 : i32
    %c0_i32_1 = arith.constant 0 : i32
    return %c0_i32, %c0_i32_0 : i32, i32
  }
  func.func @transform_6(%arg0: i32) -> (i32, i32) {
    %c0_i32 = arith.constant 0 : i32
    %c0_i32_0 = arith.constant 0 : i32
    %c0_i32_1 = arith.constant 0 : i32
    return %c0_i32, %c0_i32_0 : i32, i32
  }
  func.func @transform_7(%arg0: i32) -> (i32, i32) {
    %c0_i32 = arith.constant 0 : i32
    %c0_i32_0 = arith.constant 0 : i32
    %c0_i32_1 = arith.constant 0 : i32
    return %c0_i32, %c0_i32_0 : i32, i32
  }
  func.func @transform_8(%arg0: i32) -> (i32, i32) {
    %c0_i32 = arith.constant 0 : i32
    %c0_i32_0 = arith.constant 0 : i32
    %c0_i32_1 = arith.constant 0 : i32
    return %c0_i32, %c0_i32_0 : i32, i32
  }
  func.func @transform_9(%arg0: i32) -> (i32, i32) {
    %c0_i32 = arith.constant 0 : i32
    %c0_i32_0 = arith.constant 0 : i32
    return %arg0, %c0_i32 : i32, i32
  }
}

</mosaic_0001>

<bundles_post_ra>
// kernel: torch_wrapper_forward.1
= control target key start
LH: loop header
LB: loop body
LE: loop exit
PB: predicated region body
PF: predicated region fallthrough
CT: control target
= control target key end

     0   :  { %vm41_vm0 = vcmask 1042432   ;;  %vm119_vm1 = vcmask 1043456   ;;  %v585_v0 = vmov 0.0   ;;  %vm37_vm2 = vcmask 23552   ;;  %s734_s3 = inlined_call_operand.vmem [shape: f32[3,128], index: 3, kind: input, shape index: {}]   ;;  %s735_s2 = inlined_call_operand.vmem [shape: f32[4,128], index: 2, kind: input, shape index: {}]   ;;  %s736_s1 = inlined_call_operand.vmem [shape: f32[8,3], index: 1, kind: input, shape index: {}]   ;;  %s737_s0 = inlined_call_operand.vmem [shape: f32[8,4], index: 0, kind: input, shape index: {}]   ;;  %s738_s5 = inlined_call_operand.vmem [shape: bf16[128,128], index: 5, kind: input, shape index: {}]   ;;  %s739_s7 = inlined_call_operand.vmem [shape: bf16[128,4], index: 7, kind: input, shape index: {}]   ;;  %s740_s4 = inlined_call_operand.vmem [shape: f32[1,128], index: 4, kind: input, shape index: {}]   ;;  %s741_s6 = inlined_call_operand.vmem [shape: f32[1,128], index: 6, kind: input, shape index: {}]   ;;  %s742_s8 = inlined_call_operand.vmem [shape: f32[1,4], index: 8, kind: input, shape index: {}]   ;;  %s743_s9 = inlined_call_operand.vmem [shape: f32[8,4], index: 9, kind: output, shape index: {}]  }
   0x1   :  { %513 = vmatprep.subr.mxu0 %v585_v0  ;;  %518 = vmatprep.subr.mxu1 %v585_v0  ;;  %v36_v1 = vld [vmem:[%s734_s3] sm:$0x7]  ;;  %vm586_vm3 = vmmov 0   ;;  %vm115_vm4 = vcmask 31744   ;;  %v566_v6 = vld [vmem:[%s738_s5 + $0x8] sm:$0xff]   ;;  %v567_v7 = vld [vmem:[%s738_s5 + $0x10] sm:$0xff]  }
   0x2   :  { %v34_v2 = vld [vmem:[%s735_s2] sm:$0xf]  ;;  %514 = vmatpush3.msk.msra.mxu0 %vm41_vm0, %v36_v1  ;;  %515 = vmatprep.mubr.msk.f32.mxu0 %vm586_vm3, %v585_v0  ;;  %v568_v8 = vld [vmem:[%s738_s5 + $0x18] sm:$0xff]   ;;  %v570_v10 = vld [vmem:[%s738_s5 + $0x28] sm:$0xff]  }
   0x3   :  { %v35_v3 = vld [vmem:[%s736_s1] sm:$0xff]  ;;  %519 = vmatpush3.msk.msra.mxu1 %vm119_vm1, %v34_v2  ;;  %520 = vmatprep.mubr.msk.f32.mxu1 %vm586_vm3, %v585_v0  ;;  %v571_v11 = vld [vmem:[%s738_s5 + $0x30] sm:$0xff]   ;;  %v572_v12 = vld [vmem:[%s738_s5 + $0x38] sm:$0xff]  }
   0x4   :  { %v33_v4 = vld [vmem:[%s737_s0] sm:$0xff]  ;;  %516 = vmatmul.mubr.msk.f32.vlgmr.msra.gmra.mrb[0].mxu0 %vm37_vm2, %v35_v3  ;;  %523 = vmatprep.subr.bf16.mxu0 %v585_v0  ;;  %v574_v38 = vld [vmem:[%s739_s7 + $0x8] sm:$0xff]   ;;  %v575_v39 = vld [vmem:[%s739_s7 + $0x10] sm:$0xff]  }
   0x5   :  { %v565_v5 = vld [vmem:[%s738_s5] sm:$0xff]   ;;  %521 = vmatmul.mubr.msk.f32.vlgmr.msra.gmra.mrb[0].mxu1 %vm115_vm4, %v33_v4  ;;  %539 = vmatprep.mubr.msk.bf16.mxu0 %vm586_vm3, %v585_v0  ;;  %v576_v40 = vld [vmem:[%s739_s7 + $0x18] sm:$0xff]   ;;  %v578_v42 = vld [vmem:[%s739_s7 + $0x28] sm:$0xff]  }
   0x6   :  { %524 = vmatpush3.bf16.msra.mxu0 %v565_v5  ;;  %543 = vmatprep.subr.bf16.mxu1 %v585_v0  ;;  %v569_v9 = vld [vmem:[%s738_s5 + $0x20] sm:$0xff]   ;;  %v579_v43 = vld [vmem:[%s739_s7 + $0x30] sm:$0xff]   ;;  %v580_v44 = vld [vmem:[%s739_s7 + $0x38] sm:$0xff]  }
   0x7   :  { %525 = vmatprep.subr.bf16.mxu0 %v585_v0  ;;  %559 = vmatprep.mubr.msk.bf16.mxu1 %vm586_vm3, %v585_v0  ;;  %v573_v13 = vld [vmem:[%s739_s7] sm:$0xff]  }
   0x8   :  { %544 = vmatpush3.bf16.msra.mxu1 %v573_v13  ;;  %v470_v16 = vld [vmem:[%s740_s4] ss:$0 sm:$0xff] }
   0x9   :  { %545 = vmatprep.subr.bf16.mxu1 %v585_v0  ;;  %v577_v41 = vld [vmem:[%s739_s7 + $0x20] sm:$0xff]  }
   0xa   :  { %526 = vmatpush3.bf16.msra.mxu0 %v566_v6  ;;  %v472_v45 = vld [vmem:[%s741_s6] ss:$0 sm:$0xff] }
   0xb   :  { %527 = vmatprep.subr.bf16.mxu0 %v585_v0  ;;  %v482_v4 = vld [vmem:[%s742_s8] ss:$0 sm:$0xff] }
   0xc   :  { %546 = vmatpush3.bf16.msra.mxu1 %v574_v38 }
   0xd   :  { %547 = vmatprep.subr.bf16.mxu1 %v585_v0 }
   0xe   :  { %528 = vmatpush3.bf16.msra.mxu0 %v567_v7 }
   0xf   :  { %529 = vmatprep.subr.bf16.mxu0 %v585_v0 }
  0x10   :  { %548 = vmatpush3.bf16.msra.mxu1 %v575_v39 }
  0x11   :  { %549 = vmatprep.subr.bf16.mxu1 %v585_v0 }
  0x12   :  { %530 = vmatpush3.bf16.msra.mxu0 %v568_v8 }
  0x13   :  { %531 = vmatprep.subr.bf16.mxu0 %v585_v0 }
  0x14   :  { %550 = vmatpush3.bf16.msra.mxu1 %v576_v40 }
  0x15   :  { %551 = vmatprep.subr.bf16.mxu1 %v585_v0 }
  0x16   :  { %532 = vmatpush3.bf16.msra.mxu0 %v569_v9 }
  0x17   :  { %533 = vmatprep.subr.bf16.mxu0 %v585_v0 }
  0x18   :  { %552 = vmatpush3.bf16.msra.mxu1 %v577_v41 }
  0x19   :  { %553 = vmatprep.subr.bf16.mxu1 %v585_v0 }
  0x1a   :  { %534 = vmatpush3.bf16.msra.mxu0 %v570_v10 }
  0x1b   :  { %535 = vmatprep.subr.bf16.mxu0 %v585_v0 }
  0x1c   :  { %554 = vmatpush3.bf16.msra.mxu1 %v578_v42 }
  0x1d   :  { %555 = vmatprep.subr.bf16.mxu1 %v585_v0 }
  0x1e   :  { %536 = vmatpush3.bf16.msra.mxu0 %v571_v11 }
  0x1f   :  { %537 = vmatprep.subr.bf16.mxu0 %v585_v0 }
  0x20   :  { %556 = vmatpush3.bf16.msra.mxu1 %v579_v43 }
  0x21   :  { %557 = vmatprep.subr.bf16.mxu1 %v585_v0 }
  0x22   :  { %538 = vmatpush3.bf16.msra.mxu0 %v572_v12 }
  0x24   :  { %558 = vmatpush3.bf16.msra.mxu1 %v580_v44 }
  0xd7   :  { %v111_v14 = vpop.f32.mrb[0].mxu0 }
  0xd8   :  { %v189_v15 = vpop.f32.mrb[0].mxu1  ;;  %v517_v18 = vpop.f32.mrb[1].mxu0 }
  0xd9   :  { %v190_v17 = vadd.f32 %v189_v15, %v111_v14  ;;  %v522_v19 = vpop.f32.mrb[1].mxu1 }
  0xdb   :  { %v200_v20 = vadd.f32 %v470_v16, %v190_v17 }
  0xdd   :  { %v201_v21 = vmin.f32 %v200_v20, 0.0  ;;  %vm216_vm6 = vcmp.gt.f32.partialorder %v200_v20, 0.0 }
  0xdf   :  { %v204_v22 = vmul.f32 0.041666668, %v201_v21  ;;  %v211_v23 = vmul.f32 1.442695, %v201_v21  ;;  %v202_v28 = vand.u32 2147483647, %v201_v21 }
  0xe1   :  { %v205_v24 = vadd.f32 0.16666667, %v204_v22  ;;  %581 = vpow2.f32 %v211_v23  ;;  %vm203_vm5 = vcmp.lt.f32.partialorder %v202_v28, 0.03125 }
  0xe3   :  { %v206_v25 = vmul.f32 %v205_v24, %v201_v21 }
  0xe5   :  { %v207_v26 = vadd.f32 0.5, %v206_v25 }
  0xe7   :  { %v208_v27 = vmul.f32 %v207_v26, %v201_v21 }
  0xe9   :  { %v209_v29 = vadd.f32 1.0, %v208_v27 }
  0xeb   :  { %v582_v30 = vpop.eup %581  ;;  %v210_v31 = vmul.f32 %v209_v29, %v201_v21 }
  0xec   :  { %v471_v32 = vadd.f32 -1.0, %v582_v30 }
  0xee   :  { %v214_v33 = vsel %vm203_vm5, %v210_v31, %v471_v32 }
  0xef   :  { %v215_v34 = vmul.f32 1.6732632, %v214_v33 }
  0xf1   :  { %v217_v35 = vsel %vm216_vm6, %v200_v20, %v215_v34 }
  0xf2   :  { %v218_v36 = vmul.f32 1.050701, %v217_v35 }
  0xf4   :  { %v219_v37 = vpack.c.bf16 %v218_v36, %v218_v36 }
  0xf6   :  { %540 = vmatmul.mubr.bf16.vlgmr.msra.gmra.mrb[4].mxu0 %v219_v37 }
 0x1c9   :  { %v325_v46 = vpop.f32.mrb[4].mxu0 }
 0x1ca   :  { %v326_v47 = vadd.f32 %v472_v45, %v325_v46  ;;  %v541_v48 = vpop.f32.mrb[5].mxu0 }
 0x1cb   :  { %v328_v49 = vpop.f32.mrb[6].mxu0 }
 0x1cc   :  { %v331_v50 = vmin.f32 %v326_v47, 0.0  ;;  %v542_v51 = vpop.f32.mrb[7].mxu0  ;;  %vm346_vm8 = vcmp.gt.f32.partialorder %v326_v47, 0.0 }
 0x1ce   :  { %v334_v52 = vmul.f32 0.041666668, %v331_v50  ;;  %v341_v53 = vmul.f32 1.442695, %v331_v50  ;;  %v332_v58 = vand.u32 2147483647, %v331_v50 }
 0x1d0   :  { %v335_v54 = vadd.f32 0.16666667, %v334_v52  ;;  %583 = vpow2.f32 %v341_v53  ;;  %vm333_vm7 = vcmp.lt.f32.partialorder %v332_v58, 0.03125 }
 0x1d2   :  { %v336_v55 = vmul.f32 %v335_v54, %v331_v50 }
 0x1d4   :  { %v337_v56 = vadd.f32 0.5, %v336_v55 }
 0x1d6   :  { %v338_v57 = vmul.f32 %v337_v56, %v331_v50 }
 0x1d8   :  { %v339_v59 = vadd.f32 1.0, %v338_v57 }
 0x1da   :  { %v584_v60 = vpop.eup %583  ;;  %v340_v61 = vmul.f32 %v339_v59, %v331_v50 }
 0x1db   :  { %v481_v62 = vadd.f32 -1.0, %v584_v60 }
 0x1dd   :  { %v344_v63 = vsel %vm333_vm7, %v340_v61, %v481_v62 }
 0x1de   :  { %v345_v0 = vmul.f32 1.6732632, %v344_v63 }
 0x1e0   :  { %v347_v1 = vsel %vm346_vm8, %v326_v47, %v345_v0 }
 0x1e1   :  { %v348_v2 = vmul.f32 1.050701, %v347_v1 }
 0x1e3   :  { %v349_v3 = vpack.c.bf16 %v348_v2, %v348_v2 }
 0x1e5   :  { %560 = vmatmul.mubr.bf16.vlgmr.msra.gmra.mrb[4].mxu1 %v349_v3 }
 0x2b8   :  { %v455_v5 = vpop.f32.mrb[4].mxu1 }
 0x2b9   :  { %v456_v6 = vadd.f32 %v482_v4, %v455_v5  ;;  %v561_v7 = vpop.f32.mrb[5].mxu1 }
 0x2ba   :  { %v458_v8 = vpop.f32.mrb[6].mxu1 }
 0x2bb   :  { %461 = vst.msk [vmem:[%s743_s9] sm:$0xff] %vm115_vm4, %v456_v6  ;;  %v562_v9 = vpop.f32.mrb[7].mxu1 }

</bundles_post_ra>
